<compile_context>
chip_gen: v5e
topology: v5e:2x2
jax: 0.10.0
libtpu: 0.0.40
codegen_flags: <defaults>
</compile_context>

<pallas_src>
import jax
import jax.numpy as jnp
from jax.experimental import pallas as pl
from jax.experimental.pallas import tpu as pltpu

EPS = 1e-5           # nn.BatchNorm2d default eps
NEG_SLOPE = 0.01     # nn.LeakyReLU default negative_slope
N_CHANNEL = 2
W_OUT = 120          # conv output width
W_IN = 2 * W_OUT     # 240 input width
FC = N_CHANNEL * W_OUT   # 240 = fc_size
N_OUT = 2
LANES = 256          # 128-aligned working width inside the kernel (zero padded)


def cnn_kernel(x_ref, wself_ref, wnext_ref, wprev_ref, bvec_ref, wlin_ref, blin_ref,
               out_ref, xs_ref):
    tb = x_ref.shape[0]
    # Stage the 240-wide tile into a 256-lane (128-aligned) VMEM buffer; pad lanes <- 0.
    xs_ref[:, :W_IN] = x_ref[...]
    xs_ref[:, W_IN:] = jnp.zeros((tb, LANES - W_IN), jnp.float32)
    xs = xs_ref[...]

    # Neighbour exchange on the XLU (jnp.roll semantics): lane j picks up lane j+1 / j-1.
    x_next = pltpu.roll(xs, LANES - 1, axis=1)   # x_next[:, j] = xs[:, j+1]  (wrap lanes zeroed)
    x_prev = pltpu.roll(xs, 1, axis=1)           # x_prev[:, j] = xs[:, j-1]  (wrap lanes zeroed)

    # Conv (+ folded BN) in interleaved lane order, on the VPU.
    y = (xs * wself_ref[...] + x_next * wnext_ref[...]
         + x_prev * wprev_ref[...] + bvec_ref[...])
    # LeakyReLU on the VPU.
    act = jnp.where(y >= 0, y, NEG_SLOPE * y)
    # Linear(240 -> 2) on the MXU (K padded to 256 with zero rows in wlin).
    out_ref[...] = (jnp.dot(act, wlin_ref[...], preferred_element_type=jnp.float32)
                    + blin_ref[...])


def fold_params(params):
    """Fold eval-mode BatchNorm into the conv taps and build interleaved per-lane weight/bias
    vectors plus the row-permuted, zero-padded Linear weight."""
    # TODO(synk): training-mode batch statistics of BatchNorm2d are not implemented here.
    inv_std = jax.lax.rsqrt(params["var"] + EPS)          # (2,)
    scale = params["gamma"] * inv_std                     # (2,)
    a = params["wconv"] * scale[:, None]                  # (2, 2): a[c, k]
    b = params["beta"] - params["mean"] * scale           # (2,)

    lane = jnp.arange(LANES)
    valid = lane < W_IN
    even = ((lane % 2) == 0) & valid
    odd = ((lane % 2) == 1) & valid
    # lane 2w   -> channel 0, taps (a00 on self, a01 on next lane)
    # lane 2w+1 -> channel 1, taps (a10 on prev lane, a11 on self)
    wv_self = jnp.where(even, a[0, 0], jnp.where(odd, a[1, 1], 0.0)).reshape(1, LANES)
    wv_next = jnp.where(even, a[0, 1], 0.0).reshape(1, LANES)
    wv_prev = jnp.where(odd, a[1, 0], 0.0).reshape(1, LANES)
    bvec = jnp.where(even, b[0], jnp.where(odd, b[1], 0.0)).reshape(1, LANES)

    # Permute Linear weight rows to the interleaved layout and zero-pad K to 256:
    #   wlin_perm[2w + c, :] = wlin_T[c*120 + w, :]
    w_idx = jnp.arange(W_OUT)
    wlin_T = params["wlin_T"]                              # (240, 2), NCHW-flatten row order
    wlin_perm = jnp.zeros((LANES, N_OUT), jnp.float32)
    wlin_perm = wlin_perm.at[2 * w_idx, :].set(wlin_T[w_idx, :])              # channel 0
    wlin_perm = wlin_perm.at[2 * w_idx + 1, :].set(wlin_T[W_OUT + w_idx, :])  # channel 1

    return {
        "wv_self": wv_self.astype(jnp.float32),
        "wv_next": wv_next.astype(jnp.float32),
        "wv_prev": wv_prev.astype(jnp.float32),
        "bvec": bvec.astype(jnp.float32),
        "wlin_perm": wlin_perm,
        "blin": params["blin"],
    }


def cnn_forward(x, folded, *, tb=2048):
    """x: (B, 1, 1, 240) float32 NCHW.  Returns (B, 2) float32."""
    B = x.shape[0]
    assert x.shape[1:] == (1, 1, W_IN), "expected (B, 1, 1, 240) input"
    x_flat = x.reshape(B, W_IN)                           # layout-preserving, no extra HBM traffic

    # Batch tile: multiple of 8 (f32 sublane), capped at `tb`; pad B up to a tile multiple.
    tb_eff = min(tb, max(8, ((B + 7) // 8) * 8))
    tb_eff = ((tb_eff + 7) // 8) * 8
    b_pad = ((B + tb_eff - 1) // tb_eff) * tb_eff
    if b_pad != B:
        x_flat = jnp.pad(x_flat, ((0, b_pad - B), (0, 0)))
    grid = (b_pad // tb_eff,)

    out = pl.pallas_call(
        cnn_kernel,
        out_shape=jax.ShapeDtypeStruct((b_pad, N_OUT), jnp.float32),
        grid=grid,
        in_specs=[
            pl.BlockSpec((tb_eff, W_IN), lambda i: (i, 0)),    # input batch tile
            pl.BlockSpec((1, LANES), lambda i: (0, 0)),        # per-lane self-tap weights
            pl.BlockSpec((1, LANES), lambda i: (0, 0)),        # per-lane next-lane tap weights
            pl.BlockSpec((1, LANES), lambda i: (0, 0)),        # per-lane prev-lane tap weights
            pl.BlockSpec((1, LANES), lambda i: (0, 0)),        # folded BN bias (interleaved)
            pl.BlockSpec((LANES, N_OUT), lambda i: (0, 0)),    # permuted, padded Linear weight
            pl.BlockSpec((1, N_OUT), lambda i: (0, 0)),        # Linear bias
        ],
        out_specs=pl.BlockSpec((tb_eff, N_OUT), lambda i: (i, 0)),
        scratch_shapes=[pltpu.VMEM((tb_eff, LANES), jnp.float32)],   # 256-lane staging buffer
        compiler_params=pltpu.CompilerParams(
            dimension_semantics=("parallel",),                 # megacore batch sharding (v7x)
            vmem_limit_bytes=32 * 1024 * 1024),
    )(x_flat, folded["wv_self"], folded["wv_next"], folded["wv_prev"],
      folded["bvec"], folded["wlin_perm"], folded["blin"])
    return out[:B]


def make_params(key):
    """Deterministic synthetic parameters matching the module's shapes."""
    k = jax.random.split(key, 6)
    wconv = jax.random.normal(k[0], (N_CHANNEL, 2), jnp.float32) * 0.5   # Conv2d weight (2,1,1,2)->(2,2)
    gamma = 1.0 + 0.1 * jax.random.normal(k[1], (N_CHANNEL,), jnp.float32)
    beta = 0.1 * jax.random.normal(k[2], (N_CHANNEL,), jnp.float32)
    mean = 0.1 * jax.random.normal(k[3], (N_CHANNEL,), jnp.float32)      # running_mean
    var = jnp.abs(1.0 + 0.1 * jax.random.normal(k[4], (N_CHANNEL,), jnp.float32))  # running_var
    wlin = jax.random.normal(k[5], (N_OUT, FC), jnp.float32) * 0.05      # Linear weight (2, 240)
    blin = jnp.array([[0.01, -0.02]], jnp.float32)                       # Linear bias (1, 2)
    return {
        "wconv": wconv, "gamma": gamma, "beta": beta, "mean": mean, "var": var,
        "wlin_T": wlin.T.copy(),   # (240, 2)
        "blin": blin,
    }


def cnn_reference(x, params):
    """Pure-JAX reference of the PyTorch forward (eval-mode BN)."""
    B = x.shape[0]
    xp = x.reshape(B, W_OUT, 2)
    conv = jnp.einsum("bwk,ck->bcw", xp, params["wconv"])                # (B, 2, 120)
    inv_std = jax.lax.rsqrt(params["var"] + EPS)
    bn = (conv - params["mean"][None, :, None]) * (inv_std * params["gamma"])[None, :, None] \
         + params["beta"][None, :, None]
    act = jnp.where(bn >= 0, bn, NEG_SLOPE * bn)
    feat = act.reshape(B, -1)                                            # NCHW flatten order
    return feat @ params["wlin_T"] + params["blin"]


if __name__ == "__main__":
    key = jax.random.PRNGKey(0)
    kx1, kx2, kp = jax.random.split(key, 3)
    params = make_params(kp)
    folded = fold_params(params)

    # Test 1: tiny batch (single padded tile)
    B1 = 2
    x1 = jax.random.normal(kx1, (B1, 1, 1, W_IN), jnp.float32)
    out1 = jax.block_until_ready(cnn_forward(x1, folded))
    ref1 = cnn_reference(x1, params)
    assert out1.shape == (B1, N_OUT)
    assert jnp.allclose(out1, ref1, atol=1e-4, rtol=1e-4), (out1, ref1)

    # Test 2: multi-tile grid with batch padding (exercises the pipelined grid path)
    B2 = 300
    x2 = jax.random.normal(kx2, (B2, 1, 1, W_IN), jnp.float32)
    out2 = jax.block_until_ready(cnn_forward(x2, folded, tb=128))
    ref2 = cnn_reference(x2, params)
    assert out2.shape == (B2, N_OUT)
    assert jnp.allclose(out2, ref2, atol=1e-4, rtol=1e-4), (out2, ref2)

    print("KERNEL_OK")
</pallas_src>

<mosaic_0001>
module attributes {stable_mosaic.version = 11 : i64} {
  func.func @cnn_kernel(%arg0: i32, %arg1: memref<8x240xf32, #tpu.memory_space<vmem>>, %arg2: memref<1x256xf32, #tpu.memory_space<vmem>>, %arg3: memref<1x256xf32, #tpu.memory_space<vmem>>, %arg4: memref<1x256xf32, #tpu.memory_space<vmem>>, %arg5: memref<1x256xf32, #tpu.memory_space<vmem>>, %arg6: memref<256x2xf32, #tpu.memory_space<vmem>>, %arg7: memref<1x2xf32, #tpu.memory_space<vmem>>, %arg8: memref<8x2xf32, #tpu.memory_space<vmem>>, %arg9: memref<8x256xf32, #tpu.memory_space<vmem>>) attributes {dimension_semantics = [#tpu.dimension_semantics<parallel>], iteration_bounds = array<i64: 1>, scalar_prefetch = 0 : i64, scratch_operands = 1 : i64, tpu.core_type = #tpu.core_type<tc>, window_params = [{transform_indices = @transform_0, window_bounds = array<i64: 8, 240>}, {pipeline_mode = #tpu.pipeline_mode<synchronous>, transform_indices = @transform_1, window_bounds = array<i64: 1, 256>}, {pipeline_mode = #tpu.pipeline_mode<synchronous>, transform_indices = @transform_2, window_bounds = array<i64: 1, 256>}, {pipeline_mode = #tpu.pipeline_mode<synchronous>, transform_indices = @transform_3, window_bounds = array<i64: 1, 256>}, {pipeline_mode = #tpu.pipeline_mode<synchronous>, transform_indices = @transform_4, window_bounds = array<i64: 1, 256>}, {pipeline_mode = #tpu.pipeline_mode<synchronous>, transform_indices = @transform_5, window_bounds = array<i64: 256, 2>}, {pipeline_mode = #tpu.pipeline_mode<synchronous>, transform_indices = @transform_6, window_bounds = array<i64: 1, 2>}, {transform_indices = @transform_7, window_bounds = array<i64: 8, 2>}]} {
    %c0 = arith.constant 0 : index
    %c0_0 = arith.constant 0 : index
    %0 = vector.load %arg1[%c0, %c0_0] : memref<8x240xf32, #tpu.memory_space<vmem>>, vector<8x240xf32>
    %c0_1 = arith.constant 0 : index
    %c0_2 = arith.constant 0 : index
    %1 = vector.load %arg9[%c0_1, %c0_2] : memref<8x256xf32, #tpu.memory_space<vmem>>, vector<8x240xf32>
    tpu.vector_store %arg9[%c0_1, %c0_2], %0 {strides = array<i32>} : memref<8x256xf32, #tpu.memory_space<vmem>>, vector<8x240xf32>,
    %cst = arith.constant 0.000000e+00 : f32
    %2 = vector.broadcast %cst : f32 to vector<8x16xf32>
    %c0_3 = arith.constant 0 : index
    %c240 = arith.constant 240 : index
    %3 = vector.load %arg9[%c0_3, %c240] : memref<8x256xf32, #tpu.memory_space<vmem>>, vector<8x16xf32>
    tpu.vector_store %arg9[%c0_3, %c240], %2 {strides = array<i32>} : memref<8x256xf32, #tpu.memory_space<vmem>>, vector<8x16xf32>,
    %c0_4 = arith.constant 0 : index
    %c0_5 = arith.constant 0 : index
    %4 = vector.load %arg9[%c0_4, %c0_5] : memref<8x256xf32, #tpu.memory_space<vmem>>, vector<8x256xf32>
    %c255_i32 = arith.constant 255 : i32
    %5 = tpu.dynamic_rotate %4 by %c255_i32 dim 1 : vector<8x256xf32>, i32 -> vector<8x256xf32>
    %c1_i32 = arith.constant 1 : i32
    %6 = tpu.dynamic_rotate %4 by %c1_i32 dim 1 : vector<8x256xf32>, i32 -> vector<8x256xf32>
    %c0_6 = arith.constant 0 : index
    %c0_7 = arith.constant 0 : index
    %7 = vector.load %arg2[%c0_6, %c0_7] : memref<1x256xf32, #tpu.memory_space<vmem>>, vector<1x256xf32>
    %8 = vector.broadcast %7 : vector<1x256xf32> to vector<8x256xf32>
    %9 = arith.mulf %4, %8 : vector<8x256xf32>
    %c0_8 = arith.constant 0 : index
    %c0_9 = arith.constant 0 : index
    %10 = vector.load %arg3[%c0_8, %c0_9] : memref<1x256xf32, #tpu.memory_space<vmem>>, vector<1x256xf32>
    %11 = vector.broadcast %10 : vector<1x256xf32> to vector<8x256xf32>
    %12 = arith.mulf %5, %11 : vector<8x256xf32>
    %13 = arith.addf %9, %12 : vector<8x256xf32>
    %c0_10 = arith.constant 0 : index
    %c0_11 = arith.constant 0 : index
    %14 = vector.load %arg4[%c0_10, %c0_11] : memref<1x256xf32, #tpu.memory_space<vmem>>, vector<1x256xf32>
    %15 = vector.broadcast %14 : vector<1x256xf32> to vector<8x256xf32>
    %16 = arith.mulf %6, %15 : vector<8x256xf32>
    %17 = arith.addf %13, %16 : vector<8x256xf32>
    %c0_12 = arith.constant 0 : index
    %c0_13 = arith.constant 0 : index
    %18 = vector.load %arg5[%c0_12, %c0_13] : memref<1x256xf32, #tpu.memory_space<vmem>>, vector<1x256xf32>
    %19 = vector.broadcast %18 : vector<1x256xf32> to vector<8x256xf32>
    %20 = arith.addf %17, %19 : vector<8x256xf32>
    %cst_14 = arith.constant 0.000000e+00 : f32
    %21 = vector.broadcast %cst_14 : f32 to vector<8x256xf32>
    %22 = arith.cmpf oge, %20, %21 : vector<8x256xf32>
    %cst_15 = arith.constant 0.00999999977 : f32
    %23 = vector.broadcast %cst_15 : f32 to vector<8x256xf32>
    %24 = arith.mulf %23, %20 : vector<8x256xf32>
    %25 = arith.select %22, %20, %24 : vector<8x256xi1>, vector<8x256xf32>
    %c0_16 = arith.constant 0 : index
    %c0_17 = arith.constant 0 : index
    %26 = vector.load %arg6[%c0_16, %c0_17] : memref<256x2xf32, #tpu.memory_space<vmem>>, vector<256x2xf32>
    %cst_18 = arith.constant dense<0.000000e+00> : vector<8x2xf32>
    %27 = tpu.matmul %25, %26, %cst_18 {dimension_numbers = #tpu.dot_dimension_numbers<[1], [0], [0], [1], [0, 0, 1, 1], [], []>} : vector<8x256xf32>, vector<256x2xf32>, vector<8x2xf32> -> vector<8x2xf32>
    %c0_19 = arith.constant 0 : index
    %c0_20 = arith.constant 0 : index
    %28 = vector.load %arg7[%c0_19, %c0_20] : memref<1x2xf32, #tpu.memory_space<vmem>>, vector<1x2xf32>
    %29 = vector.broadcast %28 : vector<1x2xf32> to vector<8x2xf32>
    %30 = arith.addf %27, %29 : vector<8x2xf32>
    %c0_21 = arith.constant 0 : index
    %c0_22 = arith.constant 0 : index
    %31 = vector.load %arg8[%c0_21, %c0_22] : memref<8x2xf32, #tpu.memory_space<vmem>>, vector<8x2xf32>
    tpu.vector_store %arg8[%c0_21, %c0_22], %30 {strides = array<i32>} : memref<8x2xf32, #tpu.memory_space<vmem>>, vector<8x2xf32>,
    return
  }
  func.func @transform_0(%arg0: i32) -> (i32, i32) {
    %c0_i32 = arith.constant 0 : i32
    %c0_i32_0 = arith.constant 0 : i32
    return %arg0, %c0_i32 : i32, i32
  }
  func.func @transform_1(%arg0: i32) -> (i32, i32) {
    %c0_i32 = arith.constant 0 : i32
    %c0_i32_0 = arith.constant 0 : i32
    %c0_i32_1 = arith.constant 0 : i32
    return %c0_i32, %c0_i32_0 : i32, i32
  }
  func.func @transform_2(%arg0: i32) -> (i32, i32) {
    %c0_i32 = arith.constant 0 : i32
    %c0_i32_0 = arith.constant 0 : i32
    %c0_i32_1 = arith.constant 0 : i32
    return %c0_i32, %c0_i32_0 : i32, i32
  }
  func.func @transform_3(%arg0: i32) -> (i32, i32) {
    %c0_i32 = arith.constant 0 : i32
    %c0_i32_0 = arith.constant 0 : i32
    %c0_i32_1 = arith.constant 0 : i32
    return %c0_i32, %c0_i32_0 : i32, i32
  }
  func.func @transform_4(%arg0: i32) -> (i32, i32) {
    %c0_i32 = arith.constant 0 : i32
    %c0_i32_0 = arith.constant 0 : i32
    %c0_i32_1 = arith.constant 0 : i32
    return %c0_i32, %c0_i32_0 : i32, i32
  }
  func.func @transform_5(%arg0: i32) -> (i32, i32) {
    %c0_i32 = arith.constant 0 : i32
    %c0_i32_0 = arith.constant 0 : i32
    %c0_i32_1 = arith.constant 0 : i32
    return %c0_i32, %c0_i32_0 : i32, i32
  }
  func.func @transform_6(%arg0: i32) -> (i32, i32) {
    %c0_i32 = arith.constant 0 : i32
    %c0_i32_0 = arith.constant 0 : i32
    %c0_i32_1 = arith.constant 0 : i32
    return %c0_i32, %c0_i32_0 : i32, i32
  }
  func.func @transform_7(%arg0: i32) -> (i32, i32) {
    %c0_i32 = arith.constant 0 : i32
    %c0_i32_0 = arith.constant 0 : i32
    return %arg0, %c0_i32 : i32, i32
  }
}

</mosaic_0001>

<bundles_post_ra>
// kernel: tpu_custom_call.1
= control target key start
LH: loop header
LB: loop body
LE: loop exit
PB: predicated region body
PF: predicated region fallthrough
CT: control target
= control target key end

     0   :  { %vm29_vm0 = vcmask 916480   ;;  %vm31_vm1 = vcmask 1048448   ;;  %s179_s28 = smov 1   ;;  %s180_s29 = smov 127   ;;  %v181_v6 = vmov 0.0   ;;  %v39_v38 = vlaneseq  ;;  %s356_s0 = inlined_call_operand.vmem [shape: f32[8,240], index: 0, kind: input, shape index: {}]   ;;  %s357_s5 = inlined_call_operand.vmem [shape: f32[256,2], index: 5, kind: input, shape index: {}]   ;;  %s358_s6 = inlined_call_operand.vmem [shape: f32[1,2], index: 6, kind: input, shape index: {}]   ;;  %s359_s1 = inlined_call_operand.vmem [shape: f32[1,256], index: 1, kind: input, shape index: {}]   ;;  %s360_s2 = inlined_call_operand.vmem [shape: f32[1,256], index: 2, kind: input, shape index: {}]   ;;  %s361_s3 = inlined_call_operand.vmem [shape: f32[1,256], index: 3, kind: input, shape index: {}]   ;;  %s362_s4 = inlined_call_operand.vmem [shape: f32[1,256], index: 4, kind: input, shape index: {}]   ;;  %s363_s7 = inlined_call_operand.vmem [shape: f32[8,2], index: 7, kind: output, shape index: {}]  }
   0x1   :  { %v225_v0 = vld [vmem:[%s356_s0] sm:$0xff]  ;;  %v27_v1 = vld [vmem:[%s356_s0 + $0x8] sm:$0xff]  ;;  %v108_v2 = vld [vmem:[%s357_s5 + $0x78] sm:$0xff]  ;;  %vm169_vm6 = vcmask 15360  }
   0x2   :  { %44 = vrot.lane.b32.xlu1 %v225_v0, %s179_s28  ;;  %35 = vrot.lane.b32.xlu0 %v225_v0, %s180_s29  ;;  %v124_v3 = vld [vmem:[%s357_s5 + $0xf8] sm:$0xff]  ;;  %30 = vst.msk [vmem:[#allocation2 + $0x8] sm:$0xff] %vm29_vm0, %v27_v1  ;;  %v107_v4 = vld [vmem:[%s357_s5 + $0x70] sm:$0xff]  ;;  %v40_v40 = vand.u32 127, %v39_v38 }
   0x3   :  { %129 = vmatpush.msra.mxu0 %v108_v2  ;;  %149 = vmatpush.msra.mxu1 %v124_v3  ;;  %v123_v5 = vld [vmem:[%s357_s5 + $0xf0] sm:$0xff]  ;;  %32 = vst.msk [vmem:[#allocation2 + $0x8] sm:$0xff] %vm31_vm1, %v181_v6  ;;  %v106_v7 = vld [vmem:[%s357_s5 + $0x68] sm:$0xff]  ;;  %v105_v9 = vld [vmem:[%s357_s5 + $0x60] sm:$0xff] }
   0x4   :  { %v122_v8 = vld [vmem:[%s357_s5 + $0xe8] sm:$0xff]  ;;  %v121_v10 = vld [vmem:[%s357_s5 + $0xe0] sm:$0xff]  ;;  %v104_v11 = vld [vmem:[%s357_s5 + $0x58] sm:$0xff]  ;;  %vm48_vm2 = vcmp.lt.s32.totalorder %v40_v40, 1  ;;  %vm41_vm3 = vcmp.lt.s32.totalorder %v40_v40, 127 }
   0x5   :  { %130 = vmatpush.msra.mxu0 %v107_v4  ;;  %150 = vmatpush.msra.mxu1 %v123_v5  ;;  %v120_v12 = vld [vmem:[%s357_s5 + $0xd8] sm:$0xff]  ;;  %v103_v13 = vld [vmem:[%s357_s5 + $0x50] sm:$0xff]  ;;  %v102_v16 = vld [vmem:[%s357_s5 + $0x48] sm:$0xff] }
   0x6   :  { %v119_v14 = vld [vmem:[%s357_s5 + $0xd0] sm:$0xff]  ;;  %v118_v17 = vld [vmem:[%s357_s5 + $0xc8] sm:$0xff]  ;;  %v101_v18 = vld [vmem:[%s357_s5 + $0x40] sm:$0xff] }
   0x7   :  { %131 = vmatpush.msra.mxu0 %v106_v7  ;;  %151 = vmatpush.msra.mxu1 %v122_v8  ;;  %v117_v19 = vld [vmem:[%s357_s5 + $0xc0] sm:$0xff]  ;;  %v100_v20 = vld [vmem:[%s357_s5 + $0x38] sm:$0xff]  ;;  %v99_v22 = vld [vmem:[%s357_s5 + $0x30] sm:$0xff] }
   0x8   :  { %v116_v21 = vld [vmem:[%s357_s5 + $0xb8] sm:$0xff]  ;;  %v115_v23 = vld [vmem:[%s357_s5 + $0xb0] sm:$0xff]  ;;  %v98_v24 = vld [vmem:[%s357_s5 + $0x28] sm:$0xff] }
   0x9   :  { %132 = vmatpush.msra.mxu0 %v105_v9  ;;  %152 = vmatpush.msra.mxu1 %v121_v10  ;;  %v114_v25 = vld [vmem:[%s357_s5 + $0xa8] sm:$0xff]  ;;  %v97_v26 = vld [vmem:[%s357_s5 + $0x20] sm:$0xff]  ;;  %v96_v28 = vld [vmem:[%s357_s5 + $0x18] sm:$0xff] }
   0xa   :  { %v270_v15 = vld [vmem:[#allocation2 + $0x8] sm:$0xff]  ;;  %v113_v27 = vld [vmem:[%s357_s5 + $0xa0] sm:$0xff]  ;;  %v112_v29 = vld [vmem:[%s357_s5 + $0x98] sm:$0xff] }
   0xb   :  { %133 = vmatpush.msra.mxu0 %v104_v11  ;;  %153 = vmatpush.msra.mxu1 %v120_v12  ;;  %v95_v30 = vld [vmem:[%s357_s5 + $0x10] sm:$0xff]  ;;  %v94_v32 = vld [vmem:[%s357_s5 + $0x8] sm:$0xff]  ;;  %v93_v34 = vld [vmem:[%s357_s5] sm:$0xff] }
   0xc   :  { %46 = vrot.lane.b32.xlu1 %v270_v15, %s179_s28  ;;  %37 = vrot.lane.b32.xlu0 %v270_v15, %s180_s29  ;;  %v111_v31 = vld [vmem:[%s357_s5 + $0x90] sm:$0xff]  ;;  %v110_v33 = vld [vmem:[%s357_s5 + $0x88] sm:$0xff] }
   0xd   :  { %134 = vmatpush.msra.mxu0 %v103_v13  ;;  %154 = vmatpush.msra.mxu1 %v119_v14  ;;  %v109_v35 = vld [vmem:[%s357_s5 + $0x80] sm:$0xff] }
   0xe   :  { %v51_v39 = vld [vmem:[%s359_s1] sm:$0x3] }
   0xf   :  { %135 = vmatpush.msra.mxu0 %v102_v16  ;;  %155 = vmatpush.msra.mxu1 %v118_v17  ;;  %v59_v41 = vld [vmem:[%s360_s2] sm:$0x3]  ;;  %v53_v42 = vperm.slane %v51_v39, 0  ;;  %v54_v43 = vperm.slane %v51_v39, 1 }
  0x10   :  { %v69_v44 = vld [vmem:[%s361_s3] sm:$0x3]  ;;  %v61_v45 = vperm.slane %v59_v41, 0  ;;  %v62_v46 = vperm.slane %v59_v41, 1 }
  0x11   :  { %136 = vmatpush.msra.mxu0 %v101_v18  ;;  %156 = vmatpush.msra.mxu1 %v117_v19  ;;  %v57_v47 = vmul.f32 %v53_v42, %v225_v0  ;;  %v58_v48 = vmul.f32 %v54_v43, %v270_v15  ;;  %v71_v49 = vperm.slane %v69_v44, 0  ;;  %v72_v50 = vperm.slane %v69_v44, 1  ;;  %v79_v53 = vld [vmem:[%s362_s4] sm:$0x3] }
  0x12   :  { %v81_v60 = vperm.slane %v79_v53, 0  ;;  %v82_v61 = vperm.slane %v79_v53, 1  ;;  %v178_v10 = vld [vmem:[%s358_s6] ss:$0 sm:$0xff] }
  0x13   :  { %137 = vmatpush.msra.mxu0 %v100_v20  ;;  %157 = vmatpush.msra.mxu1 %v116_v21 }
  0x15   :  { %138 = vmatpush.msra.mxu0 %v99_v22  ;;  %158 = vmatpush.msra.mxu1 %v115_v23 }
  0x17   :  { %139 = vmatpush.msra.mxu0 %v98_v24  ;;  %159 = vmatpush.msra.mxu1 %v114_v25 }
  0x19   :  { %140 = vmatpush.msra.mxu0 %v97_v26  ;;  %160 = vmatpush.msra.mxu1 %v113_v27 }
  0x1b   :  { %141 = vmatpush.msra.mxu0 %v96_v28  ;;  %161 = vmatpush.msra.mxu1 %v112_v29 }
  0x1d   :  { %142 = vmatpush.msra.mxu0 %v95_v30  ;;  %162 = vmatpush.msra.mxu1 %v111_v31 }
  0x1f   :  { %143 = vmatpush.msra.mxu0 %v94_v32  ;;  %163 = vmatpush.msra.mxu1 %v110_v33 }
  0x21   :  { %144 = vmatpush.msra.mxu0 %v93_v34  ;;  %164 = vmatpush.msra.mxu1 %v109_v35 }
  0x74   :  { %v45_v36 = vpop.permute.xlu1 %44  ;;  %v36_v37 = vpop.permute.xlu0 %35 }
  0x7e   :  { %v47_v51 = vpop.permute.xlu1 %46  ;;  %v38_v52 = vpop.permute.xlu0 %37 }
  0x7f   :  { %v49_v54 = vsel %vm48_vm2, %v45_v36, %v47_v51  ;;  %v50_v55 = vsel %vm48_vm2, %v47_v51, %v45_v36  ;;  %v42_v56 = vsel %vm41_vm3, %v36_v37, %v38_v52  ;;  %v43_v57 = vsel %vm41_vm3, %v38_v52, %v36_v37 }
  0x80   :  { %v65_v58 = vmul.f32 %v61_v45, %v42_v56  ;;  %v66_v59 = vmul.f32 %v62_v46, %v43_v57  ;;  %v75_v62 = vmul.f32 %v71_v49, %v50_v55  ;;  %v76_v63 = vmul.f32 %v72_v50, %v49_v54 }
  0x82   :  { %v67_v0 = vadd.f32 %v65_v58, %v57_v47  ;;  %v68_v1 = vadd.f32 %v66_v59, %v58_v48 }
  0x84   :  { %v77_v2 = vadd.f32 %v75_v62, %v67_v0  ;;  %v78_v3 = vadd.f32 %v76_v63, %v68_v1 }
  0x86   :  { %v85_v4 = vadd.f32 %v81_v60, %v77_v2  ;;  %v86_v5 = vadd.f32 %v82_v61, %v78_v3 }
  0x88   :  { %vm87_vm4 = vcmp.ge.f32.partialorder %v85_v4, 0.0  ;;  %v89_v6 = vmul.f32 0.01, %v85_v4  ;;  %vm88_vm5 = vcmp.ge.f32.partialorder %v86_v5, 0.0  ;;  %v90_v7 = vmul.f32 0.01, %v86_v5 }
  0x8a   :  { %v91_v8 = vsel %vm87_vm4, %v85_v4, %v89_v6  ;;  %v92_v9 = vsel %vm88_vm5, %v86_v5, %v90_v7 }
  0x8b   :  { %145 = vmatmul.f32.vlgmr.msra.gmra.mxu0 %v91_v8  ;;  %165 = vmatmul.f32.vlgmr.msra.gmra.mxu1 %v92_v9 }
 0x108   :  { %v146_v11 = vpop.f32.mrf.mxu0  ;;  %v166_v13 = vpop.f32.mrf.mxu1 }
 0x109   :  { %v147_v12 = vadd.f32 %v178_v10, %v146_v11 }
 0x10b   :  { %v167_v14 = vadd.f32 %v166_v13, %v147_v12 }
 0x10d   :  { %170 = vst.msk [vmem:[%s363_s7] sm:$0xff] %vm169_vm6, %v167_v14 }

</bundles_post_ra>
